<compile_context>
chip_gen: v5e
topology: v5e:2x2
jax: 0.10.0
libtpu: 0.0.40
codegen_flags: <defaults>
</compile_context>

<pallas_src>
import jax
import jax.numpy as jnp
import numpy as np
from jax import lax
from jax.experimental import pallas as pl
from jax.experimental.pallas import tpu as pltpu

BN_EPS = 1e-5


def dense_kernel(x_ref, w_ref, gamma_ref, beta_ref, o_ref):
    """One (Dout-tile j, Din-tile k) grid step.

    x_ref:      (N, TK)  bf16  full-batch activation slab for this K tile
    w_ref:      (TK, TN) bf16  weight tile, already transposed to (Din, Dout)
    gamma_ref:  (1, TN)  f32   BN scale
    beta_ref:   (1, TN)  f32   BN shift
    o_ref:      (N, TN)  f32   output tile; same block across k -> VMEM-resident
                               accumulator, written back to HBM once per j.
    """
    k = pl.program_id(1)

    @pl.when(k == 0)
    def _init():
        o_ref[...] = jnp.zeros_like(o_ref)

    # (N, TK) @ (TK, TN): transpose-free MXU feed, f32 accumulation into o_ref.
    o_ref[...] += lax.dot_general(
        x_ref[...],
        w_ref[...],
        dimension_numbers=(((1,), (0,)), ((), ())),
        preferred_element_type=jnp.float32,
    )

    @pl.when(k == pl.num_programs(1) - 1)
    def _epilogue():
        y = o_ref[...]                                          # (N, TN) f32, full K sum
        inv_n = 1.0 / y.shape[0]
        # Centered two-pass statistics over the (full, un-tiled) batch dimension.
        mean = jnp.sum(y, axis=0, keepdims=True) * inv_n        # (1, TN)
        centered = y - mean
        var = jnp.sum(centered * centered, axis=0, keepdims=True) * inv_n
        scale = gamma_ref[...] * lax.rsqrt(var + BN_EPS)        # (1, TN)
        o_ref[...] = jnp.maximum(centered * scale + beta_ref[...], 0.0).astype(o_ref.dtype)


def _round_up(v, m):
    return ((v + m - 1) // m) * m


def _vmem_budget():
    """(physical capacity, usable budget) in bytes for the current TPU generation."""
    try:
        cap = int(pltpu.get_tpu_info().vmem_capacity_bytes)
    except Exception:  # pragma: no cover - fall back to the smallest (v7x per-TC) VMEM
        cap = 64 * 1024 * 1024
    return cap, (cap * 3) // 4


def _pick_tiles(n, d_in_p, d_out_p, budget):
    """Largest lane-dense tiles whose per-step footprint fits the VMEM budget."""

    def footprint(tn, tk):
        return (2 * n * tk * 2        # x bf16, double-buffered
                + 2 * tk * tn * 2     # w bf16, double-buffered
                + 2 * n * tn * 4      # f32 output block (resident + writeback buffer)
                + 4 * tn * 4)         # gamma/beta

    tn_cands = [c for c in (512, 256, 128) if d_out_p % c == 0] or [128]
    tk_cands = [c for c in (1024, 512, 256, 128) if d_in_p % c == 0] or [128]
    for tn in tn_cands:               # larger TN first: fewer redundant x re-reads
        for tk in tk_cands:           # then larger TK: fewer grid steps
            fp = footprint(tn, tk)
            if fp <= budget:
                return tn, tk, fp
    tn, tk = tn_cands[-1], tk_cands[-1]
    return tn, tk, footprint(tn, tk)


def dense_forward(x, weight, bias, gamma, beta):
    """Fused Linear(+bias) -> BatchNorm1d(train) -> ReLU.

    x:      (N, Din) float
    weight: (Dout, Din)  -- PyTorch nn.Linear layout
    bias:   (Dout,)      -- accepted for signature parity; training-mode BN removes it
                            exactly, so it is not fed to the kernel.
    gamma, beta: (Dout,) -- BatchNorm1d affine parameters.
    """
    del bias  # exact no-op under training-mode BatchNorm (batch mean cancels it)

    x = jnp.asarray(x, jnp.float32)
    w = jnp.asarray(weight, jnp.float32)
    n, d_in = x.shape
    d_out = w.shape[0]

    d_in_p = _round_up(d_in, 128)
    d_out_p = _round_up(d_out, 128)

    # Zero-pad the contraction / feature dims to lane-dense multiples of 128.  Zero
    # columns/rows contribute nothing to the matmul; padded output features (gamma=1,
    # beta=0 -> finite, zero output) are sliced off below.
    x_p = jnp.pad(x, ((0, 0), (0, d_in_p - d_in))) if d_in_p != d_in else x
    w_t = w.T  # (Din, Dout): transpose-free MXU feed in-kernel
    # TODO(synk): ideally store the weight pre-transposed at parameter-init time so this
    # one-off XLA transpose never appears per call.
    if d_in_p != d_in or d_out_p != d_out:
        w_t = jnp.pad(w_t, ((0, d_in_p - d_in), (0, d_out_p - d_out)))

    g2 = jnp.pad(jnp.asarray(gamma, jnp.float32), (0, d_out_p - d_out),
                 constant_values=1.0).reshape(1, d_out_p)
    b2 = jnp.pad(jnp.asarray(beta, jnp.float32),
                 (0, d_out_p - d_out)).reshape(1, d_out_p)

    # bf16 operands for the MXU; accumulation and BN math stay f32 in-kernel.
    x_bf = x_p.astype(jnp.bfloat16)
    w_bf = w_t.astype(jnp.bfloat16)

    cap, budget = _vmem_budget()
    tn, tk, fp = _pick_tiles(n, d_in_p, d_out_p, budget)
    grid = (d_out_p // tn, d_in_p // tk)  # reduction (Din) axis last
    vmem_limit = int(min(max(budget, fp * 5 // 4), cap * 9 // 10))

    cost = pl.CostEstimate(
        flops=2 * n * d_in_p * d_out_p + 8 * n * d_out_p,
        transcendentals=d_out_p,  # rsqrt per feature
        bytes_accessed=(2 * n * d_in_p * grid[0]       # x re-read once per Dout tile
                        + 2 * d_in_p * d_out_p          # weight (bf16)
                        + 4 * n * d_out_p               # f32 output
                        + 8 * d_out_p),                 # gamma/beta
    )

    out = pl.pallas_call(
        dense_kernel,
        out_shape=jax.ShapeDtypeStruct((n, d_out_p), jnp.float32),
        grid_spec=pltpu.PrefetchScalarGridSpec(
            num_scalar_prefetch=0,
            grid=grid,
            in_specs=[
                pl.BlockSpec((n, tk), lambda j, k: (0, k)),    # x: full batch, K tile
                pl.BlockSpec((tk, tn), lambda j, k: (k, j)),   # W^T (Din, Dout) tile
                pl.BlockSpec((1, tn), lambda j, k: (0, j)),    # gamma
                pl.BlockSpec((1, tn), lambda j, k: (0, j)),    # beta
            ],
            out_specs=pl.BlockSpec((n, tn), lambda j, k: (0, j)),  # resident across k
        ),
        compiler_params=pltpu.CompilerParams(
            # Dout tiles are independent (BN is per-feature) -> parallel; Din is the
            # accumulation axis -> arbitrary.
            # TODO(synk): on v7x evaluate pltpu.CORE_PARALLEL on the j axis to guarantee
            # the dual-TensorCore split when MXU-bound.
            dimension_semantics=("parallel", "arbitrary"),
            vmem_limit_bytes=vmem_limit,
        ),
        cost_estimate=cost,
    )(x_bf, w_bf, g2, b2)

    return out[:, :d_out] if d_out_p != d_out else out


def reference_forward(x, weight, bias, gamma, beta):
    """Pure-JAX f32 reference matching the PyTorch module (train-mode BN, biased var)."""
    y = x @ weight.T + bias
    mean = jnp.mean(y, axis=0, keepdims=True)
    var = jnp.mean((y - mean) ** 2, axis=0, keepdims=True)
    y = (y - mean) / jnp.sqrt(var + BN_EPS)
    y = y * gamma + beta
    return jnp.maximum(y, 0.0)


if __name__ == "__main__":
    key = jax.random.PRNGKey(0)

    def run_case(batch, in_features, out_features, case_key):
        k_x, k_w, k_b = jax.random.split(case_key, 3)
        x = jax.random.normal(k_x, (batch, in_features), dtype=jnp.float32)
        # PyTorch-style init: Linear U(-1/sqrt(in), 1/sqrt(in)); BN gamma=1, beta=0.
        bound = 1.0 / np.sqrt(in_features)
        weight = jax.random.uniform(
            k_w, (out_features, in_features), minval=-bound, maxval=bound,
            dtype=jnp.float32)
        bias = jax.random.uniform(
            k_b, (out_features,), minval=-bound, maxval=bound, dtype=jnp.float32)
        gamma = jnp.ones((out_features,), jnp.float32)
        beta = jnp.zeros((out_features,), jnp.float32)

        out = jax.block_until_ready(dense_forward(x, weight, bias, gamma, beta))
        ref = reference_forward(x, weight, bias, gamma, beta)
        # bf16 operands with f32 accumulation: ~1e-2-class agreement vs the f32 reference.
        np.testing.assert_allclose(np.asarray(out), np.asarray(ref), rtol=3e-2, atol=3e-2)

    k1, k2 = jax.random.split(key)
    run_case(64, 768, 640, k1)   # multi-tile grid on both axes (TN=128, TK=256)
    run_case(32, 300, 200, k2)   # exercises the pad-to-128 path (Din->384, Dout->256)

    print("KERNEL_OK")
</pallas_src>

<mosaic_0001>
module attributes {stable_mosaic.version = 11 : i64} {
  func.func @dense_kernel(%arg0: i32, %arg1: i32, %arg2: memref<64x256xbf16, #tpu.memory_space<vmem>>, %arg3: memref<256x128xbf16, #tpu.memory_space<vmem>>, %arg4: memref<1x128xf32, #tpu.memory_space<vmem>>, %arg5: memref<1x128xf32, #tpu.memory_space<vmem>>, %arg6: memref<64x128xf32, #tpu.memory_space<vmem>>) attributes {dimension_semantics = [#tpu.dimension_semantics<parallel>, #tpu.dimension_semantics<arbitrary>], iteration_bounds = array<i64: 5, 3>, scalar_prefetch = 0 : i64, scratch_operands = 0 : i64, tpu.core_type = #tpu.core_type<tc>, window_params = [{transform_indices = @transform_0, window_bounds = array<i64: 64, 256>}, {transform_indices = @transform_1, window_bounds = array<i64: 256, 128>}, {transform_indices = @transform_2, window_bounds = array<i64: 1, 128>}, {transform_indices = @transform_3, window_bounds = array<i64: 1, 128>}, {transform_indices = @transform_4, window_bounds = array<i64: 64, 128>}]} {
    %c0_i32 = arith.constant 0 : i32
    %0 = arith.cmpi eq, %arg1, %c0_i32 : i32
    %1 = arith.extui %0 : i1 to i32
    %c0_i32_0 = arith.constant 0 : i32
    %2 = arith.cmpi ne, %1, %c0_i32_0 : i32
    scf.if %2 {
      %cst_9 = arith.constant 0.000000e+00 : f32
      %12 = vector.broadcast %cst_9 : f32 to vector<64x128xf32>
      %c0_10 = arith.constant 0 : index
      %c0_11 = arith.constant 0 : index
      %13 = vector.load %arg6[%c0_10, %c0_11] : memref<64x128xf32, #tpu.memory_space<vmem>>, vector<64x128xf32>
      tpu.vector_store %arg6[%c0_10, %c0_11], %12 {strides = array<i32>} : memref<64x128xf32, #tpu.memory_space<vmem>>, vector<64x128xf32>,
    } else {
    }
    %c0 = arith.constant 0 : index
    %c0_1 = arith.constant 0 : index
    %3 = vector.load %arg6[%c0, %c0_1] : memref<64x128xf32, #tpu.memory_space<vmem>>, vector<64x128xf32>
    %c0_2 = arith.constant 0 : index
    %c0_3 = arith.constant 0 : index
    %4 = vector.load %arg2[%c0_2, %c0_3] : memref<64x256xbf16, #tpu.memory_space<vmem>>, vector<64x256xbf16>
    %c0_4 = arith.constant 0 : index
    %c0_5 = arith.constant 0 : index
    %5 = vector.load %arg3[%c0_4, %c0_5] : memref<256x128xbf16, #tpu.memory_space<vmem>>, vector<256x128xbf16>
    %cst = arith.constant dense<0.000000e+00> : vector<64x128xf32>
    %6 = tpu.matmul %4, %5, %cst {dimension_numbers = #tpu.dot_dimension_numbers<[1], [0], [0], [1], [0, 0, 1, 1], [], []>} : vector<64x256xbf16>, vector<256x128xbf16>, vector<64x128xf32> -> vector<64x128xf32>
    %7 = arith.addf %3, %6 : vector<64x128xf32>
    %c0_6 = arith.constant 0 : index
    %c0_7 = arith.constant 0 : index
    %8 = vector.load %arg6[%c0_6, %c0_7] : memref<64x128xf32, #tpu.memory_space<vmem>>, vector<64x128xf32>
    tpu.vector_store %arg6[%c0_6, %c0_7], %7 {strides = array<i32>} : memref<64x128xf32, #tpu.memory_space<vmem>>, vector<64x128xf32>,
    %c2_i32 = arith.constant 2 : i32
    %9 = arith.cmpi eq, %arg1, %c2_i32 : i32
    %10 = arith.extui %9 : i1 to i32
    %c0_i32_8 = arith.constant 0 : i32
    %11 = arith.cmpi ne, %10, %c0_i32_8 : i32
    scf.if %11 {
      %c0_9 = arith.constant 0 : index
      %c0_10 = arith.constant 0 : index
      %12 = vector.load %arg6[%c0_9, %c0_10] : memref<64x128xf32, #tpu.memory_space<vmem>>, vector<64x128xf32>
      %cst_11 = arith.constant dense<0.000000e+00> : vector<128xf32>
      %13 = vector.multi_reduction <add>, %12, %cst_11 [0] : vector<64x128xf32> to vector<128xf32>
      %14 = vector.shape_cast %13 : vector<128xf32> to vector<1x128xf32>
      %cst_12 = arith.constant 1.562500e-02 : f32
      %15 = vector.broadcast %cst_12 : f32 to vector<1x128xf32>
      %16 = arith.mulf %14, %15 : vector<1x128xf32>
      %17 = vector.broadcast %16 : vector<1x128xf32> to vector<64x128xf32>
      %18 = arith.subf %12, %17 : vector<64x128xf32>
      %19 = arith.mulf %18, %18 : vector<64x128xf32>
      %cst_13 = arith.constant dense<0.000000e+00> : vector<128xf32>
      %20 = vector.multi_reduction <add>, %19, %cst_13 [0] : vector<64x128xf32> to vector<128xf32>
      %21 = vector.shape_cast %20 : vector<128xf32> to vector<1x128xf32>
      %cst_14 = arith.constant 1.562500e-02 : f32
      %22 = vector.broadcast %cst_14 : f32 to vector<1x128xf32>
      %23 = arith.mulf %21, %22 : vector<1x128xf32>
      %c0_15 = arith.constant 0 : index
      %c0_16 = arith.constant 0 : index
      %24 = vector.load %arg4[%c0_15, %c0_16] : memref<1x128xf32, #tpu.memory_space<vmem>>, vector<1x128xf32>
      %cst_17 = arith.constant 9.99999974E-6 : f32
      %25 = vector.broadcast %cst_17 : f32 to vector<1x128xf32>
      %26 = arith.addf %23, %25 : vector<1x128xf32>
      %27 = math.rsqrt %26 : vector<1x128xf32>
      %28 = arith.mulf %24, %27 : vector<1x128xf32>
      %29 = vector.broadcast %28 : vector<1x128xf32> to vector<64x128xf32>
      %30 = arith.mulf %18, %29 : vector<64x128xf32>
      %c0_18 = arith.constant 0 : index
      %c0_19 = arith.constant 0 : index
      %31 = vector.load %arg5[%c0_18, %c0_19] : memref<1x128xf32, #tpu.memory_space<vmem>>, vector<1x128xf32>
      %32 = vector.broadcast %31 : vector<1x128xf32> to vector<64x128xf32>
      %33 = arith.addf %30, %32 : vector<64x128xf32>
      %cst_20 = arith.constant 0.000000e+00 : f32
      %34 = vector.broadcast %cst_20 : f32 to vector<64x128xf32>
      %35 = arith.maximumf %33, %34 : vector<64x128xf32>
      %c0_21 = arith.constant 0 : index
      %c0_22 = arith.constant 0 : index
      %36 = vector.load %arg6[%c0_21, %c0_22] : memref<64x128xf32, #tpu.memory_space<vmem>>, vector<64x128xf32>
      tpu.vector_store %arg6[%c0_21, %c0_22], %35 {strides = array<i32>} : memref<64x128xf32, #tpu.memory_space<vmem>>, vector<64x128xf32>,
    } else {
    }
    return
  }
  func.func @transform_0(%arg0: i32, %arg1: i32) -> (i32, i32) {
    %c0_i32 = arith.constant 0 : i32
    %c0_i32_0 = arith.constant 0 : i32
    return %c0_i32, %arg1 : i32, i32
  }
  func.func @transform_1(%arg0: i32, %arg1: i32) -> (i32, i32) {
    %c0_i32 = arith.constant 0 : i32
    return %arg1, %arg0 : i32, i32
  }
  func.func @transform_2(%arg0: i32, %arg1: i32) -> (i32, i32) {
    %c0_i32 = arith.constant 0 : i32
    %c0_i32_0 = arith.constant 0 : i32
    return %c0_i32, %arg0 : i32, i32
  }
  func.func @transform_3(%arg0: i32, %arg1: i32) -> (i32, i32) {
    %c0_i32 = arith.constant 0 : i32
    %c0_i32_0 = arith.constant 0 : i32
    return %c0_i32, %arg0 : i32, i32
  }
  func.func @transform_4(%arg0: i32, %arg1: i32) -> (i32, i32) {
    %c0_i32 = arith.constant 0 : i32
    %c0_i32_0 = arith.constant 0 : i32
    return %c0_i32, %arg0 : i32, i32
  }
}

</mosaic_0001>

<bundles_post_ra>
// kernel: tpu_custom_call.1
= control target key start
LH: loop header
LB: loop body
LE: loop exit
PB: predicated region body
PF: predicated region fallthrough
CT: control target
= control target key end

     0   :  { %s1894_s0 = inlined_call_operand.hbm [shape: bf16[64,768], index: 0, kind: input, shape index: {}]   ;;  %s1895_s1 = inlined_call_operand.hbm [shape: bf16[768,640], index: 1, kind: input, shape index: {}]   ;;  %s1896_s2 = inlined_call_operand.hbm [shape: f32[1,640], index: 2, kind: input, shape index: {}]   ;;  %s1897_s3 = inlined_call_operand.hbm [shape: f32[1,640], index: 3, kind: input, shape index: {}]   ;;  %s1898_s4 = inlined_call_operand.hbm [shape: f32[64,640], index: 4, kind: output, shape index: {}]  }
   0x1   :  { %1905 = sst [smem:[#allocation26_spill]] %s1894_s0 }
   0x2   :  { %1906 = sst [smem:[#allocation27_spill]] %s1895_s1 }
   0x3   :  { %1907 = sst [smem:[#allocation28_spill]] %s1897_s3 }
   0x4   :  { %1908 = sst [smem:[#allocation29_spill]] %s1898_s4 }
   0x5   :  { %9 = vsyncpa [#allocation3], 0 }
   0x6   :  { %11 = vsyncpa [#allocation3 + $0x1], 0 }
   0x7   :  { %12 = vsyncpa [#allocation6], 0 }
   0x8   :  { %14 = vsyncpa [#allocation6 + $0x1], 0 }
   0x9   :  { %15 = vsyncpa [#allocation9], 0 }
   0xa   :  { %17 = vsyncpa [#allocation9 + $0x1], 0 }
   0xb   :  { %18 = vsyncpa [#allocation4], 0 }
   0xc   :  { %20 = vsyncpa [#allocation4 + $0x1], 0  ;;  %s1510_s15 = smov 0   ;;  %s1512_s16 = smov 0  }
   0xd   :  { %s1514_s17 = smov 0   ;;  %s1516_s18 = smov 0  }
   0xe   :  { %s1518_s19 = smov 0   ;;  %s1520_s20 = smov 0  }
   0xf   :  { %s1522_s21 = smov 0   ;;  %s1524_s22 = smov 0  }
  0x10   :  { %s1526_s23 = smov 0   ;;  %s1528_s24 = smov 0  }
  0x11   :  { %s1530_s25 = smov 0   ;;  %s1532_s26 = smov 0  }
  0x12   :  { %s1534_s27 = smov 0   ;;  %s1536_s28 = smov 0  }
  0x13 LB: > { %1909 = sst [smem:[#allocation16_spill]] %s1441_s20  ;;  %s35_s29 = sadd.s32 1, %s1465_s26  ;;  %s1473_s28 = sphi %s1536_s28, %s26_s28   ;;  %s1469_s27 = sphi %s1534_s27, %s1952_s27   ;;  %s1465_s26 = sphi %s1532_s26, %s1941_s26   ;;  %s1461_s25 = sphi %s1530_s25, %s1951_s25   ;;  %s1457_s24 = sphi %s1528_s24, %s1940_s24   ;;  %s1453_s23 = sphi %s1526_s23, %s1939_s23   ;;  %s1449_s22 = sphi %s1524_s22, %s1950_s22   ;;  %s1445_s21 = sphi %s1522_s21, %s1949_s21   ;;  %s1441_s20 = sphi %s1520_s20, %s1937_s20   ;;  %s1437_s19 = sphi %s1518_s19, %s1948_s19   ;;  %s1433_s18 = sphi %s1516_s18, %s1947_s18   ;;  %s1429_s17 = sphi %s1514_s17, %s1946_s17   ;;  %s1425_s16 = sphi %s1512_s16, %s1945_s16   ;;  %s1421_s15 = sphi %s1510_s15, %s1944_s15  }
  0x14   : > { %1910 = sst [smem:[#allocation17_spill]] %s1453_s23  ;;  %s38_s30 = sadd.s32 1, %s1469_s27 }
  0x15   : > { %1911 = sst [smem:[#allocation18_spill]] %s1457_s24  ;;  %p36_p0 = scmp.ge.s32.totalorder %s35_s29, 3 }
  0x16   : > { %1912 = sst [smem:[#allocation19_spill]] %s1461_s25  ;;  %p53_p1 = scmp.eq.s32.totalorder %s1473_s28, 0 }
  0x17   : > { %1913 = sst [smem:[#allocation20_spill]] %s1465_s26  ;;  %s73_s5 = sadd.s32 1, %s1441_s20 }
  0x18   : > { %p80_p2 = scmp.ne.s32.totalorder %s1441_s20, %s1437_s19  ;;  %s1954_s29 = smov (%p36_p0, %s35_s29), 0 }
  0x19   : > { %1914 = sst [smem:[#allocation21_spill]] %s1954_s29  ;;  %s1956_s30 = smov (!%p36_p0, %s38_s30), %s1469_s27 }
  0x1a   : > { %s1591_s6 = ssub.s32 %s1465_s26, %s1954_s29  ;;  %p1595_p3 = por %p80_p2, %p53_p1 }
  0x1b   : > { %p40_p4 = scmp.ge.s32.totalorder %s1956_s30, 5  ;;  %p43_p5 = scmp.eq.s32.totalorder %s1591_s6, 0 }
  0x1c   : > { %p86_p6 = scmp.ne.s32.totalorder %s1437_s19, %s1433_s18  ;;  %p1068_p7 = scmp.lt.s32.totalorder %s1473_s28, 15 }
  0x1d   : > { %s1958_s30 = smov (%p40_p4, %s1956_s30), 0  ;;  %s210_s8 = sand.u32 1, %s1473_s28  }
  0x1e   : > { %1916 = sst [smem:[#allocation22_spill]] %s1958_s30  ;;  %s1608_s9 = ssub.s32 %s1469_s27, %s1958_s30 }
  0x1f   : > { %s70_s10 = sor.u32 %s1608_s9, %s1591_s6  ;;  %s212_s11 = sand.u32 1, %s1441_s20  }
  0x20   : > { %p71_p8 = scmp.eq.s32.totalorder %s70_s10, 0  ;;  %s889_s12 = sshll.u32 %s212_s11, 7 }
  0x21   : > { %s1040_s13 = smul.u32 160, %s1465_s26  ;;  %s214_s4 = scalar_lea.vmem [#allocation5], %s889_s12 }
  0x22   : > { %s1615_s14 = scalar_select %p71_p8, %s1441_s20, %s73_s5  }
  0x23   : > { %s219_s29 = sadd.s32 %s1469_s27, %s1040_s13  ;;  %s224_s25 = sshll.u32 %s214_s4, 4  ;;  %s225_s25 = int_to_ptr.vmem [resolvable:$true] %s224_s25 }
  0x24   : > { %1917 = sst [smem:[#allocation23_spill]] %s1615_s14  ;;  %s892_s24 = sshll.u32 %s219_s29, 2 }
  0x25   : > { %s1918_s1 = sld [smem:[#allocation27_spill]]  ;;  %p1055_p9 = pnand %p1068_p7, %p1595_p3 }
  0x26   : > { %s1625_s4 = scalar_lea.sflag [#allocation6], %s210_s8  ;;  %s1475_s29 = smov 320  }
  0x27   : > { %s1476_s11 = smov 64   ;;  %s1477_s12 = smov 4  }
  0x28   : > { %p893_p10 = scmp.ge.s32.totalorder %s1473_s28, 1  ;;  %p266_p11 = scmp.lt.s32.totalorder %s1473_s28, 16 }
  0x29   : > { %p52_p13 = scmp.ne.s32.totalorder %s1453_s23, %s1449_s22  ;;  %p58_p0 = scmp.ne.s32.totalorder %s1449_s22, %s1445_s21 }
  0x2a   : > { %p1630_p12 = pnand %p893_p10, %p266_p11  ;;  %s188_s7 = sand.u32 1, %s1453_s23  }
  0x2b   : > { %s221_s10 = scalar_lea.hbm %s1918_s1, %s892_s24  ;;  %s45_s24 = sadd.s32 1, %s1453_s23 }
  0x2c   : > { %s222_s5 = sshll.u32 %s221_s10, 4  ;;  %s999_s8 = sshll.u32 %s1465_s26, 3  ;;  %s223_s5 = int_to_ptr.hbm [resolvable:$true] %s222_s5 }
  0x2d   : > { %1057 = dma.hbm_to_vmem [thread:$0]  (!%p1055_p9), %s223_s5, 2048, %s225_s25, %s1625_s4, %s1475_s29, %s1476_s11, %s1477_s12  }
  0x2e   : > { %s1638_s30 = scalar_select %p43_p5, %s1453_s23, %s45_s24  }
  0x2f   : > { %p54_p2 = por %p53_p1, %p52_p13  ;;  %s886_s25 = sshll.u32 %s188_s7, 6 }
  0x30   : > { %1920 = sst [smem:[#allocation24_spill]] %s1638_s30  ;;  %s192_s6 = scalar_lea.vmem [#allocation2], %s886_s25 }
  0x31   : > { %s1921_s0 = sld [smem:[#allocation26_spill]]  ;;  %s200_s11 = sshll.u32 %s192_s6, 4  ;;  %s201_s11 = int_to_ptr.vmem [resolvable:$true] %s200_s11 }
  0x32   : > { %p1052_p3 = pnand %p1068_p7, %p54_p2  ;;  %s189_s12 = scalar_lea.sflag [#allocation3], %s188_s7 }
  0x33   : > { %s1478_s24 = smov 384   ;;  %s1480_s13 = smov 8  }
  0x34   : > { %s1654_s10 = sadd.s32 4294967295, %s1473_s28   ;;  %s883_s25 = sadd.s32 4294967294, %s1473_s28  }
  0x35   : > { %p59_p4 = scmp.eq.s32.totalorder %s1654_s10, 0  ;;  %p97_p5 = scmp.eq.s32.totalorder %s1608_s9, 0 }
  0x36   : > { %p106_p8 = scmp.ne.s32.totalorder %s1429_s17, %s1425_s16  ;;  %p112_p13 = scmp.ne.s32.totalorder %s1425_s16, %s1421_s15 }
  0x37   : > { %s197_s5 = scalar_lea.hbm %s1921_s0, %s999_s8  ;;  %s1479_s8 = smov 128  }
  0x38   : > { %s198_s29 = sshll.u32 %s197_s5, 4  ;;  %s99_s5 = sadd.s32 1, %s1429_s17  ;;  %s199_s29 = int_to_ptr.hbm [resolvable:$true] %s198_s29 }
  0x39   : > { %1054 = dma.hbm_to_vmem [thread:$0]  (!%p1052_p3), %s199_s29, 1024, %s201_s11, %s189_s12, %s1478_s24, %s1479_s8, %s1480_s13  }
  0x3a   : > { %p1665_p9 = por %p59_p4, %p58_p0  ;;  %p1672_p10 = por %p86_p6, %p59_p4 }
  0x3b   : > { %s1677_s29 = scalar_select %p97_p5, %s1429_s17, %s99_s5  }
  0x3c   : > { %p1681_p11 = por %p106_p8, %p53_p1  ;;  %p162_p0 = scmp.eq.s32.totalorder %s1654_s10, 14 }
  0x3d   : > { %1924 = sst [smem:[#allocation25_spill]] %s1677_s29  ;;  %p168_p2 = scmp.eq.s32.totalorder %s883_s25, 14 }
  0x3e   : > { %p1688_p3 = por %p112_p13, %p59_p4  ;;  %s236_s21 = sand.u32 1, %s1429_s17  }
  0x3f   : > { %p1693_p6 = por %p162_p0, %p106_p8  ;;  %p1697_p5 = por %p168_p2, %p112_p13 }
  0x40   : > { %s240_s13 = scalar_lea.hbm %s1896_s2, %s1469_s27  ;;  %s237_s0 = scalar_lea.vmem [#allocation7], %s236_s21 }
  0x41   : > { %s242_s5 = sshll.u32 %s240_s13, 4  ;;  %s244_s25 = sshll.u32 %s237_s0, 4  ;;  %s243_s5 = int_to_ptr.hbm [resolvable:$true] %s242_s5  ;;  %s245_s25 = int_to_ptr.vmem [resolvable:$true] %s244_s25 }
  0x42   : > { %p1058_p1 = pnand %p1068_p7, %p1681_p11  ;;  %s1929_s30 = sld [smem:[#allocation28_spill]] }
  0x43   : > { %s254_s20 = scalar_lea.vmem [#allocation8], %s236_s21  ;;  %s252_s24 = scalar_lea.sflag [#allocation9], %s236_s21 }
  0x44   : > { %1060 = dma.hbm_to_vmem [thread:$0]  (!%p1058_p1), %s243_s5, 16, %s245_s25, %s1625_s4  }
  0x45   : > { %s261_s29 = sshll.u32 %s254_s20, 4  ;;  %s272_s0 = sand.u32 (!%p1630_p12), 1, %s1449_s22   ;;  %s262_s29 = int_to_ptr.vmem [resolvable:$true] %s261_s29 }
  0x46   : > { %270 = sbr.rel (%p1630_p12) target bundleno = 423 (0x1a7), region = 36  ;;  %s894_s11 = sshll.u32 (!%p1630_p12), %s272_s0, 6 }
  0x47   : > { %s273_s8 = scalar_lea.sflag (!%p1630_p12), [#allocation3], %s272_s0  ;;  %s1717_s13 = scalar_lea.vmem (!%p1630_p12), [#allocation2], %s894_s11 }
  0x48   : > { %s257_s23 = scalar_lea.hbm %s1929_s30, %s1469_s27 }
  0x49   : > { %s259_s14 = sshll.u32 %s257_s23, 4  ;;  %s260_s14 = int_to_ptr.hbm [resolvable:$true] %s259_s14 }
  0x4a   : > { %1063 = dma.hbm_to_vmem [thread:$0]  (!%p1058_p1), %s260_s14, 16, %s262_s29, %s252_s24  }
  0x4b   : > { %1400 = dma.done.wait (%p1665_p9), %s273_s8, 1024  }
  0x4c   : > { %1402 = vsyncadd (%p1665_p9), %s273_s8, 4294966272  ;;  %s282_s1 = sand.u32 1, %s1654_s10   ;;  %s284_s20 = sand.u32 1, %s1437_s19  }
  0x4d   : > { %s895_s23 = sshll.u32 %s284_s20, 7  ;;  %s283_s26 = scalar_lea.sflag [#allocation6], %s282_s1 }
  0x4e   : > { %s1725_s14 = scalar_lea.vmem [#allocation5], %s895_s23 }
  0x4f   : > { %1404 = dma.done.wait (%p1672_p10), %s283_s26, 2048  }
  0x50   : > { %1406 = vsyncadd (%p1672_p10), %s283_s26, 4294965248  ;;  %s1732_s4 = sand.u32 1, %s1425_s16  }
  0x51   : > { %s295_s3 = scalar_lea.vmem [#allocation7], %s1732_s4 }
  0x52   : > { %1408 = dma.done.wait (%p1688_p3), %s283_s26, 16  }
  0x53   : > { %1410 = vsyncadd (%p1688_p3), %s283_s26, 4294967280  ;;  %s302_s30 = scalar_lea.sflag [#allocation9], %s1732_s4  ;;  %s304_s10 = scalar_lea.vmem [#allocation8], %s1732_s4 }
  0x54   : > { %1412 = dma.done.wait (%p1688_p3), %s302_s30, 16  }
  0x55   : > { %1414 = vsyncadd (%p1688_p3), %s302_s30, 4294967280  ;;  %s896_s6 = sshll.u32 %s1732_s4, 6  ;;  %s1930_s29 = sld [smem:[#allocation18_spill]] }
  0x56   : > { %s1746_s7 = scalar_lea.vmem [#allocation10], %s896_s6 }
  0x5b   : > { %p897_p7 = scmp.ne.s32.totalorder %s1930_s29, 0 }
  0x5d   : > { %348 = sbr.rel (%p897_p7) target bundleno = 107 (0x6b), region = 56 }
  0x62   : > { %v1481_v0 = vmov 0.0  }
  0x63   : > { %349 = vst [vmem:[%s1746_s7] sm:$0xff] %v1481_v0 }
  0x64   : > { %350 = vst [vmem:[%s1746_s7 + $0x8] sm:$0xff] %v1481_v0 }
  0x65   : > { %351 = vst [vmem:[%s1746_s7 + $0x10] sm:$0xff] %v1481_v0 }
  0x66   : > { %352 = vst [vmem:[%s1746_s7 + $0x18] sm:$0xff] %v1481_v0 }
  0x67   : > { %353 = vst [vmem:[%s1746_s7 + $0x20] sm:$0xff] %v1481_v0 }
  0x68   : > { %354 = vst [vmem:[%s1746_s7 + $0x28] sm:$0xff] %v1481_v0 }
  0x69   : > { %355 = vst [vmem:[%s1746_s7 + $0x30] sm:$0xff] %v1481_v0 }
  0x6a   : > { %356 = vst [vmem:[%s1746_s7 + $0x38] sm:$0xff] %v1481_v0 }
  0x6b PF: > { %v1015_v1 = vld [vmem:[%s1725_s14 + $0x38] sm:$0xff]  ;;  %v1014_v3 = vld [vmem:[%s1725_s14 + $0x30] sm:$0xff]  ;;  %v1013_v5 = vld [vmem:[%s1725_s14 + $0x28] sm:$0xff]  ;;  %s1931_s18 = sld [smem:[#allocation18_spill]] }
  0x6c   : > { %v1023_v2 = vld [vmem:[%s1725_s14 + $0x78] sm:$0xff]  ;;  %541 = vmatpush.bf16.msra.mxu0 %v1015_v1  ;;  %1024 = vmatpush.bf16.msra.mxu2 %v1015_v1  ;;  %v1022_v4 = vld [vmem:[%s1725_s14 + $0x70] sm:$0xff]  ;;  %v1021_v6 = vld [vmem:[%s1725_s14 + $0x68] sm:$0xff] }
  0x6d   : > { %570 = vmatpush.bf16.msra.mxu1 %v1023_v2  ;;  %1032 = vmatpush.bf16.msra.mxu3 %v1023_v2  ;;  %v1012_v7 = vld [vmem:[%s1725_s14 + $0x20] sm:$0xff]  ;;  %v1011_v9 = vld [vmem:[%s1725_s14 + $0x18] sm:$0xff]  ;;  %v1010_v11 = vld [vmem:[%s1725_s14 + $0x10] sm:$0xff] }
  0x6e   : > { %v1020_v8 = vld [vmem:[%s1725_s14 + $0x60] sm:$0xff]  ;;  %v1019_v10 = vld [vmem:[%s1725_s14 + $0x58] sm:$0xff]  ;;  %v1018_v12 = vld [vmem:[%s1725_s14 + $0x50] sm:$0xff] }
  0x6f   : > { %v1009_v13 = vld [vmem:[%s1725_s14 + $0x8] sm:$0xff]  ;;  %v1008_v15 = vld [vmem:[%s1725_s14] sm:$0xff]  ;;  %v908_v29 = vld [vmem:[%s1717_s13 + $0x10] sm:$0xf] }
  0x70   : > { %542 = vmatpush.bf16.msra.mxu0 %v1014_v3  ;;  %1025 = vmatpush.bf16.msra.mxu2 %v1014_v3  ;;  %v1017_v14 = vld [vmem:[%s1725_s14 + $0x48] sm:$0xff]  ;;  %v1016_v16 = vld [vmem:[%s1725_s14 + $0x40] sm:$0xff]  ;;  %v1003_v30 = vld [vmem:[%s1717_s13 + $0x14] sm:$0xf0] }
  0x71   : > { %571 = vmatpush.bf16.msra.mxu1 %v1022_v4  ;;  %1033 = vmatpush.bf16.msra.mxu3 %v1022_v4  ;;  %v900_v17 = vld [vmem:[%s1717_s13] sm:$0xf]  ;;  %v1001_v18 = vld [vmem:[%s1717_s13 + $0x4] sm:$0xf0]  ;;  %v1000_v21 = vld [vmem:[%s1717_s13 + $0x4] sm:$0xf]  ;;  %v909_v37 = vor.u32 %v1003_v30, %v908_v29 }
  0x72   : > { %v916_v19 = vld [vmem:[%s1717_s13 + $0x20] sm:$0xf]  ;;  %v1005_v20 = vld [vmem:[%s1717_s13 + $0x24] sm:$0xf0]  ;;  %v902_v22 = vld [vmem:[%s1717_s13 + $0x8] sm:$0xf0]  ;;  %v901_v25 = vor.u32 %v1001_v18, %v900_v17 }
  0x73   : > { %v1004_v23 = vld [vmem:[%s1717_s13 + $0x24] sm:$0xf]  ;;  %v918_v24 = vld [vmem:[%s1717_s13 + $0x28] sm:$0xf0]  ;;  %v917_v26 = vor.u32 %v1005_v20, %v916_v19  ;;  %v905_v27 = vor.u32 %v1000_v21, %v902_v22  ;;  %v924_v31 = vld [vmem:[%s1717_s13 + $0x30] sm:$0xf] }
  0x74   : > { %543 = vmatpush.bf16.msra.mxu0 %v1013_v5  ;;  %1026 = vmatpush.bf16.msra.mxu2 %v1013_v5  ;;  %v921_v28 = vor.u32 %v1004_v23, %v918_v24  ;;  %v1007_v32 = vld [vmem:[%s1717_s13 + $0x34] sm:$0xf0]  ;;  %v1002_v33 = vld [vmem:[%s1717_s13 + $0x14] sm:$0xf]  ;;  %v910_v34 = vld [vmem:[%s1717_s13 + $0x18] sm:$0xf0] }
  0x75   : > { %572 = vmatpush.bf16.msra.mxu1 %v1021_v6  ;;  %1034 = vmatpush.bf16.msra.mxu3 %v1021_v6  ;;  %v1006_v35 = vld [vmem:[%s1717_s13 + $0x34] sm:$0xf]  ;;  %v926_v36 = vld [vmem:[%s1717_s13 + $0x38] sm:$0xf0]  ;;  %v925_v38 = vor.u32 %v1007_v32, %v924_v31  ;;  %v913_v39 = vor.u32 %v1002_v33, %v910_v34  ;;  %v357_v42 = vld [vmem:[%s1746_s7] sm:$0xff]  ;;  %p994_p12 = scmp.ne.s32.totalorder %s1931_s18, 2 }
  0x76   : > { %v929_v40 = vor.u32 %v1006_v35, %v926_v36  ;;  %v361_v47 = vld [vmem:[%s1746_s7 + $0x20] sm:$0xff]  ;;  %v358_v51 = vld [vmem:[%s1746_s7 + $0x8] sm:$0xff]  ;;  %v359_v61 = vld [vmem:[%s1746_s7 + $0x10] sm:$0xff] }
  0x77   : > { %v362_v57 = vld [vmem:[%s1746_s7 + $0x28] sm:$0xff]  ;;  %v363_v3 = vld [vmem:[%s1746_s7 + $0x30] sm:$0xff] }
  0x78   : > { %544 = vmatpush.bf16.msra.mxu0 %v1012_v7  ;;  %1027 = vmatpush.bf16.msra.mxu2 %v1012_v7  ;;  %v360_v7 = vld [vmem:[%s1746_s7 + $0x18] sm:$0xff] }
  0x79   : > { %573 = vmatpush.bf16.msra.mxu1 %v1020_v8  ;;  %1035 = vmatpush.bf16.msra.mxu3 %v1020_v8 }
  0x7c   : > { %545 = vmatpush.bf16.msra.mxu0 %v1011_v9  ;;  %1028 = vmatpush.bf16.msra.mxu2 %v1011_v9 }
  0x7d   : > { %574 = vmatpush.bf16.msra.mxu1 %v1019_v10  ;;  %1036 = vmatpush.bf16.msra.mxu3 %v1019_v10 }
  0x80   : > { %546 = vmatpush.bf16.msra.mxu0 %v1010_v11  ;;  %1029 = vmatpush.bf16.msra.mxu2 %v1010_v11 }
  0x81   : > { %575 = vmatpush.bf16.msra.mxu1 %v1018_v12  ;;  %1037 = vmatpush.bf16.msra.mxu3 %v1018_v12 }
  0x84   : > { %547 = vmatpush.bf16.msra.mxu0 %v1009_v13  ;;  %1030 = vmatpush.bf16.msra.mxu2 %v1009_v13  ;;  %v364_v13 = vld [vmem:[%s1746_s7 + $0x38] sm:$0xff] }
  0x85   : > { %576 = vmatpush.bf16.msra.mxu1 %v1017_v14  ;;  %1038 = vmatpush.bf16.msra.mxu3 %v1017_v14 }
  0x88   : > { %548 = vmatpush.bf16.msra.mxu0 %v1008_v15  ;;  %1031 = vmatpush.bf16.msra.mxu2 %v1008_v15 }
  0x89   : > { %577 = vmatpush.bf16.msra.mxu1 %v1016_v16  ;;  %1039 = vmatpush.bf16.msra.mxu3 %v1016_v16 }
  0x8b   : > { %549 = vmatmul.bf16.vlgmr.msra.gmra.mxu0 %v901_v25  ;;  %559 = vmatmul.bf16.vlgmr.msra.gmra.mxu2 %v917_v26 }
  0x8c   : > { %578 = vmatmul.bf16.vlgmr.msra.gmra.mxu1 %v905_v27  ;;  %588 = vmatmul.bf16.vlgmr.msra.gmra.mxu3 %v921_v28 }
  0x9b   : > { %554 = vmatmul.bf16.gmra.mxu0 %v909_v37  ;;  %564 = vmatmul.bf16.gmra.mxu2 %v925_v38 }
  0x9c   : > { %583 = vmatmul.bf16.gmra.mxu1 %v913_v39  ;;  %593 = vmatmul.bf16.gmra.mxu3 %v929_v40 }
 0x108   : > { %v550_v41 = vpop.f32.mrf.mxu0 }
 0x109   : > { %v579_v43 = vpop.f32.mrf.mxu1 }
 0x10a   : > { %v580_v44 = vadd.f32 %v579_v43, %v550_v41 }
 0x10c   : > { %v599_v45 = vadd.f32 %v580_v44, %v357_v42 }
 0x10e   : > { %607 = vst [vmem:[%s1746_s7] sm:$0xff] %v599_v45  ;;  %v560_v46 = vpop.f32.mrf.mxu2 }
 0x10f   : > { %v589_v48 = vpop.f32.mrf.mxu3 }
 0x110   : > { %v590_v49 = vadd.f32 %v589_v48, %v560_v46  ;;  %v552_v50 = vpop.f32.mrf.mxu0 }
 0x111   : > { %v581_v52 = vpop.f32.mrf.mxu1 }
 0x112   : > { %v603_v53 = vadd.f32 %v590_v49, %v361_v47  ;;  %v582_v54 = vadd.f32 %v581_v52, %v552_v50 }
 0x114   : > { %611 = vst [vmem:[%s1746_s7 + $0x20] sm:$0xff] %v603_v53  ;;  %v600_v55 = vadd.f32 %v582_v54, %v358_v51 }
 0x116   : > { %608 = vst [vmem:[%s1746_s7 + $0x8] sm:$0xff] %v600_v55  ;;  %v562_v56 = vpop.f32.mrf.mxu2 }
 0x117   : > { %v591_v58 = vpop.f32.mrf.mxu3 }
 0x118   : > { %v592_v59 = vadd.f32 %v591_v58, %v562_v56  ;;  %v555_v60 = vpop.f32.mrf.mxu0 }
 0x119   : > { %v584_v62 = vpop.f32.mrf.mxu1 }
 0x11a   : > { %v604_v63 = vadd.f32 %v592_v59, %v362_v57  ;;  %v585_v0 = vadd.f32 %v584_v62, %v555_v60 }
 0x11c   : > { %612 = vst [vmem:[%s1746_s7 + $0x28] sm:$0xff] %v604_v63  ;;  %v601_v1 = vadd.f32 %v585_v0, %v359_v61 }
 0x11e   : > { %609 = vst [vmem:[%s1746_s7 + $0x10] sm:$0xff] %v601_v1  ;;  %v565_v2 = vpop.f32.mrf.mxu2 }
 0x11f   : > { %v594_v4 = vpop.f32.mrf.mxu3 }
 0x120   : > { %v595_v5 = vadd.f32 %v594_v4, %v565_v2  ;;  %v557_v6 = vpop.f32.mrf.mxu0 }
 0x121   : > { %v586_v8 = vpop.f32.mrf.mxu1 }
 0x122   : > { %v605_v9 = vadd.f32 %v595_v5, %v363_v3  ;;  %v587_v10 = vadd.f32 %v586_v8, %v557_v6 }
 0x124   : > { %613 = vst [vmem:[%s1746_s7 + $0x30] sm:$0xff] %v605_v9  ;;  %v602_v11 = vadd.f32 %v587_v10, %v360_v7 }
 0x126   : > { %610 = vst [vmem:[%s1746_s7 + $0x18] sm:$0xff] %v602_v11  ;;  %v567_v12 = vpop.f32.mrf.mxu2 }
 0x127   : > { %v596_v14 = vpop.f32.mrf.mxu3 }
 0x128   : > { %v597_v15 = vadd.f32 %v596_v14, %v567_v12  ;;  %618 = sbr.rel (%p994_p12) target bundleno = 400 (0x190), region = 60 }
 0x12a   : > { %v606_v16 = vadd.f32 %v597_v15, %v364_v13 }
 0x12c   : > { %614 = vst [vmem:[%s1746_s7 + $0x38] sm:$0xff] %v606_v16 }
 0x12d   : > { %v619_v17 = vld [vmem:[%s1746_s7] sm:$0xff]  ;;  %v620_v18 = vld [vmem:[%s1746_s7 + $0x8] sm:$0xff]  ;;  %v621_v19 = vld [vmem:[%s1746_s7 + $0x10] sm:$0xff] }
 0x12e   : > { %v627_v20 = vadd.f32 %v620_v18, %v619_v17  ;;  %v622_v21 = vld [vmem:[%s1746_s7 + $0x18] sm:$0xff]  ;;  %v623_v23 = vld [vmem:[%s1746_s7 + $0x20] sm:$0xff]  ;;  %v624_v25 = vld [vmem:[%s1746_s7 + $0x28] sm:$0xff] }
 0x12f   : > { %v625_v27 = vld [vmem:[%s1746_s7 + $0x30] sm:$0xff]  ;;  %v671_v11 = vld [vmem:[%s295_s3] sm:$0x1] }
 0x130   : > { %v628_v22 = vadd.f32 %v627_v20, %v621_v19  ;;  %v1192_v16 = vld [vmem:[%s304_s10] ss:$0 sm:$0xff] }
 0x132   : > { %v629_v24 = vadd.f32 %v628_v22, %v622_v21 }
 0x133   : > { %v626_v29 = vld [vmem:[%s1746_s7 + $0x38] sm:$0xff] }
 0x134   : > { %v630_v26 = vadd.f32 %v629_v24, %v623_v23 }
 0x136   : > { %v631_v28 = vadd.f32 %v630_v26, %v624_v25 }
 0x138   : > { %v632_v30 = vadd.f32 %v631_v28, %v625_v27 }
 0x13a   : > { %v633_v31 = vadd.f32 %v632_v30, %v626_v29 }
 0x13c   : > { %v634_v32 = vrot.slane %v633_v31, 4 }
 0x13e   : > { %v635_v33 = vadd.f32 %v634_v32, %v633_v31 }
 0x140   : > { %v636_v34 = vrot.slane %v635_v33, 2 }
 0x142   : > { %v637_v35 = vadd.f32 %v636_v34, %v635_v33 }
 0x144   : > { %v638_v36 = vrot.slane %v637_v35, 1 }
 0x146   : > { %v639_v37 = vadd.f32 %v638_v36, %v637_v35 }
 0x148   : > { %v640_v38 = vmul.f32 0.015625, %v639_v37 }
 0x14a   : > { %v641_v39 = vsub.f32 %v619_v17, %v640_v38  ;;  %v642_v40 = vsub.f32 %v620_v18, %v640_v38  ;;  %v643_v41 = vsub.f32 %v621_v19, %v640_v38  ;;  %v644_v42 = vsub.f32 %v622_v21, %v640_v38 }
 0x14b   : > { %v645_v43 = vsub.f32 %v623_v23, %v640_v38  ;;  %v646_v47 = vsub.f32 %v624_v25, %v640_v38  ;;  %v647_v50 = vsub.f32 %v625_v27, %v640_v38  ;;  %v648_v53 = vsub.f32 %v626_v29, %v640_v38 }
 0x14c   : > { %v649_v44 = vmul.f32 %v641_v39, %v641_v39  ;;  %v650_v45 = vmul.f32 %v642_v40, %v642_v40  ;;  %v651_v46 = vmul.f32 %v643_v41, %v643_v41  ;;  %v652_v48 = vmul.f32 %v644_v42, %v644_v42 }
 0x14d   : > { %v653_v51 = vmul.f32 %v645_v43, %v645_v43  ;;  %v654_v54 = vmul.f32 %v646_v47, %v646_v47  ;;  %v655_v56 = vmul.f32 %v647_v50, %v647_v50  ;;  %v656_v58 = vmul.f32 %v648_v53, %v648_v53 }
 0x14e   : > { %v657_v49 = vadd.f32 %v650_v45, %v649_v44 }
 0x150   : > { %v658_v52 = vadd.f32 %v657_v49, %v651_v46 }
 0x152   : > { %v659_v55 = vadd.f32 %v658_v52, %v652_v48 }
 0x154   : > { %v660_v57 = vadd.f32 %v659_v55, %v653_v51 }
 0x156   : > { %v661_v59 = vadd.f32 %v660_v57, %v654_v54 }
 0x158   : > { %v662_v60 = vadd.f32 %v661_v59, %v655_v56 }
 0x15a   : > { %v663_v61 = vadd.f32 %v662_v60, %v656_v58 }
 0x15c   : > { %v664_v62 = vrot.slane %v663_v61, 4 }
 0x15e   : > { %v665_v63 = vadd.f32 %v664_v62, %v663_v61 }
 0x160   : > { %v666_v0 = vrot.slane %v665_v63, 2 }
 0x162   : > { %v667_v1 = vadd.f32 %v666_v0, %v665_v63 }
 0x164   : > { %v668_v2 = vrot.slane %v667_v1, 1 }
 0x166   : > { %v669_v3 = vadd.f32 %v668_v2, %v667_v1 }
 0x168   : > { %v670_v4 = vmul.f32 0.015625, %v669_v3 }
 0x16a   : > { %v672_v5 = vadd.f32 1e-05, %v670_v4 }
 0x16c   : > { %1193 = vrsqrt.f32 %v672_v5  ;;  %vm679_vm0 = vweird.f32 %v672_v5 }
 0x172   : > { %v1194_v6 = vpop.eup %1193 }
 0x173   : > { %v674_v7 = vmul.f32 %v1194_v6, %v672_v5  ;;  %vm680_vm1 = vweird.f32 %v1194_v6 }
 0x174   : > { %vm681_vm2 = vmor %vm679_vm0, %vm680_vm1 }
 0x175   : > { %v675_v8 = vmul.f32 %v1194_v6, %v674_v7 }
 0x177   : > { %v676_v9 = vmul.f32 0.5, %v675_v8 }
 0x179   : > { %v677_v10 = vsub.f32 1.5, %v676_v9 }
 0x17b   : > { %v678_v12 = vmul.f32 %v1194_v6, %v677_v10 }
 0x17d   : > { %v682_v13 = vsel %vm681_vm2, %v1194_v6, %v678_v12 }
 0x17e   : > { %v683_v14 = vmul.f32 %v682_v13, %v671_v11 }
 0x180   : > { %v685_v15 = vperm.slane %v683_v14, 0 }
 0x182   : > { %v687_v17 = vmul.f32 %v685_v15, %v641_v39  ;;  %v688_v18 = vmul.f32 %v685_v15, %v642_v40  ;;  %v689_v19 = vmul.f32 %v685_v15, %v643_v41  ;;  %v690_v20 = vmul.f32 %v685_v15, %v644_v42 }
 0x183   : > { %v691_v21 = vmul.f32 %v685_v15, %v645_v43  ;;  %v692_v22 = vmul.f32 %v685_v15, %v646_v47  ;;  %v693_v23 = vmul.f32 %v685_v15, %v647_v50  ;;  %v694_v24 = vmul.f32 %v685_v15, %v648_v53 }
 0x184   : > { %v699_v25 = vadd.f32 %v1192_v16, %v687_v17  ;;  %v700_v26 = vadd.f32 %v1192_v16, %v688_v18  ;;  %v701_v27 = vadd.f32 %v1192_v16, %v689_v19  ;;  %v702_v28 = vadd.f32 %v1192_v16, %v690_v20 }
 0x185   : > { %v703_v29 = vadd.f32 %v1192_v16, %v691_v21  ;;  %v704_v30 = vadd.f32 %v1192_v16, %v692_v22  ;;  %v705_v34 = vadd.f32 %v1192_v16, %v693_v23  ;;  %v706_v36 = vadd.f32 %v1192_v16, %v694_v24 }
 0x186   : > { %v707_v31 = vmax.f32 %v699_v25, 0.0  ;;  %v708_v32 = vmax.f32 %v700_v26, 0.0  ;;  %v709_v33 = vmax.f32 %v701_v27, 0.0  ;;  %v710_v35 = vmax.f32 %v702_v28, 0.0 }
 0x187   : > { %v711_v37 = vmax.f32 %v703_v29, 0.0  ;;  %v712_v38 = vmax.f32 %v704_v30, 0.0  ;;  %v713_v39 = vmax.f32 %v705_v34, 0.0  ;;  %v714_v40 = vmax.f32 %v706_v36, 0.0 }
 0x188   : > { %715 = vst [vmem:[%s1746_s7] sm:$0xff] %v707_v31 }
 0x189   : > { %716 = vst [vmem:[%s1746_s7 + $0x8] sm:$0xff] %v708_v32 }
 0x18a   : > { %717 = vst [vmem:[%s1746_s7 + $0x10] sm:$0xff] %v709_v33 }
 0x18b   : > { %718 = vst [vmem:[%s1746_s7 + $0x18] sm:$0xff] %v710_v35 }
 0x18c   : > { %719 = vst [vmem:[%s1746_s7 + $0x20] sm:$0xff] %v711_v37 }
 0x18d   : > { %720 = vst [vmem:[%s1746_s7 + $0x28] sm:$0xff] %v712_v38 }
 0x18e   : > { %721 = vst [vmem:[%s1746_s7 + $0x30] sm:$0xff] %v713_v39 }
 0x18f   : > { %722 = vst [vmem:[%s1746_s7 + $0x38] sm:$0xff] %v714_v40 }
 0x190 PF: > { %s1932_s21 = sld [smem:[#allocation19_spill]]  ;;  %s735_s8 = sshll.u32 %s1746_s7, 4  ;;  %s736_s8 = int_to_ptr.vmem [resolvable:$true] %s735_s8 }
 0x191   : > { %s1933_s0 = sld [smem:[#allocation29_spill]]  ;;  %s724_s1 = scalar_lea.sflag [#allocation4], %s1732_s4 }
 0x196   : > { %s996_s5 = sshll.u32 %s1932_s21, 3 }
 0x197   : > { %s734_s11 = scalar_lea.hbm %s1933_s0, %s996_s5  ;;  %s1335_s3 = scalar_lea.hbm %s1933_s0, 320 }
 0x198   : > { %s737_s13 = sshll.u32 %s734_s11, 4  ;;  %s738_s13 = int_to_ptr.hbm [resolvable:$true] %s737_s13 }
 0x199   : > { %s1329_s20 = sshra.s32 %s738_s13, 4  ;;  %s1330_s20 = int_to_ptr.hbm [resolvable:$true] %s1329_s20 }
 0x19a   : > { %s1331_s23 = scalar_lea.hbm %s1330_s20, 64  ;;  %p1336_p10 = scmp.lt.s32.totalorder %s1330_s20, %s1933_s0 }
 0x19b   : > { %p1332_p4 = scmp.ne.s32.totalorder %s1330_s20, %s1331_s23  ;;  %p1337_p11 = scmp.lt.s32.totalorder %s1335_s3, %s1331_s23 }
 0x19d   : > { %p1333_p8 = pnand %p1332_p4, %p1693_p6  ;;  %p1338_p13 = por %p1337_p11, %p1336_p10 }
 0x19f   : > { %p1334_p9 = pneg %p1333_p8 }
 0x1a1   : > { %p1339_p0 = pnand %p1338_p13, %p1334_p9 }
 0x1a3   : > { %1342 = shalt.err (!%p1339_p0)
}
 0x1a4   : > { %s1482_s4 = smov 128   ;;  %s1483_s6 = smov 640  }
 0x1a5   : > { %s1484_s7 = smov 8  }
 0x1a6   : > { %1049 = dma.vmem_to_hbm [thread:$0]  (%p1693_p6), %s736_s8, 1024, %s738_s13, %s724_s1, %s1482_s4, %s1483_s6, %s1484_s7  }
 0x1a7 PF: > { %p1069_p2 = scmp.ge.s32.totalorder %s1473_s28, 2  ;;  %s752_s29 = sand.u32 1, %s1421_s15  }
 0x1a8   : > { %s753_s18 = scalar_lea.sflag [#allocation4], %s752_s29 }
 0x1a9   : > { %p1065_p3 = pnand %p1069_p2, %p1697_p5 }
 0x1ab   : > { %p1066_p1 = pneg %p1065_p3 }
 0x1ad   : > { %1416 = dma.done.wait (%p1066_p1), %s753_s18, 1024  }
 0x1ae   : > { %1418 = vsyncadd (%p1066_p1), %s753_s18, 4294966272  ;;  %s26_s28 = sadd.s32 1, %s1473_s28   ;;  %s1935_s9 = sld [smem:[#allocation25_spill]] }
 0x1af   : > { %p1847_p7 = scmp.ge.s32.totalorder %s26_s28, 17   ;;  %s1936_s5 = sld [smem:[#allocation16_spill]] }
 0x1b0   : > { %s1937_s20 = sld [smem:[#allocation23_spill]]  ;;  %s1944_s15 = smov %s1425_s16 }
 0x1b1   : > { %s1938_s25 = sld [smem:[#allocation17_spill]]  ;;  %s1945_s16 = smov %s1429_s17 }
 0x1b2   : > { %s1939_s23 = sld [smem:[#allocation24_spill]]  ;;  %s1947_s18 = smov %s1437_s19 }
 0x1b3   : > { %s1940_s24 = sld [smem:[#allocation20_spill]]  ;;  %s1949_s21 = smov %s1449_s22 }
 0x1b4   : > { %s1941_s26 = sld [smem:[#allocation21_spill]]  ;;  %s1946_s17 = smov %s1935_s9 }
 0x1b5   : > { %s1942_s12 = sld [smem:[#allocation22_spill]]  ;;  %s1948_s19 = smov %s1936_s5 }
 0x1b7   : > { %s1950_s22 = smov %s1938_s25  ;;  %s1951_s25 = smov %s1469_s27 }
 0x1b8   :  { %25 = sbr.rel (!%p1847_p7) target bundleno = 19 (0x13), region = 126 }
 0x1bb   : > { %s1952_s27 = smov %s1942_s12 }
 0x1bd   :  { %759 = vsyncpa [#allocation3], 1 }
 0x1be   :  { %761 = vsyncpa [#allocation3 + $0x1], 1 }
 0x1bf   :  { %762 = vsyncpa [#allocation6], 1 }
 0x1c0   :  { %764 = vsyncpa [#allocation6 + $0x1], 1 }
 0x1c1   :  { %765 = vsyncpa [#allocation9], 1 }
 0x1c2   :  { %767 = vsyncpa [#allocation9 + $0x1], 1 }
 0x1c3   :  { %768 = vsyncpa [#allocation4], 1 }
 0x1c4   :  { %770 = vsyncpa [#allocation4 + $0x1], 1 }

</bundles_post_ra>
